<compile_context>
chip_gen: v7x
topology: tpu7x:2x2x1
jax: 0.10.0
libtpu: 0.0.40
codegen_flags: <defaults>
</compile_context>

<pallas_src>
import jax
import jax.numpy as jnp
from jax.experimental import pallas as pl
from jax.experimental.pallas import tpu as pltpu

_LANE = 128
_SUBLANE = 8


def _interp_layer_kernel(x_ref, w_ref, o_ref):
    # Pure VPU hot path: relu on the resident weight row + broadcasted multiply.
    w = jnp.maximum(w_ref[...], 0.0)                    # [1, TF]
    o_ref[...] = (x_ref[...] * w).astype(o_ref.dtype)   # [TB, TF]


def _tile_budget_and_min_grid():
    """Per-x-tile byte budget and minimum grid steps, keyed on TPU generation."""
    try:
        kind = jax.devices()[0].device_kind.lower()
    except Exception:  # pragma: no cover - defensive
        kind = ""
    if "7" in kind:                     # v7x: 2 TCs, 3.2 TB/s, 64 MiB VMEM/TC
        return 6 * 1024 * 1024, 2       # 24 MiB dbl-buffered in+out < 32 MiB scoped
    if "v6" in kind or "6e" in kind:    # v6e: 1 TC, ~1.4 TB/s, 128 MiB VMEM
        return 4 * 1024 * 1024, 1       # 16 MiB dbl-buffered < 32 MiB scoped
    return 2 * 1024 * 1024, 1           # v5e / unknown: 8 MiB < 16 MiB scoped


def interpretable_layer(x: jax.Array, weight: jax.Array, *, block_rows=None) -> jax.Array:
    """Computes x * relu(weight), broadcasting weight over the batch axis.

    x:      [B, F]
    weight: [F]
    Output dtype follows jnp.result_type(x, weight).
    """
    B, F = x.shape
    assert weight.shape == (F,), (weight.shape, F)
    out_dtype = jnp.result_type(x.dtype, weight.dtype)

    # ---- lane-dense repack: small F -> full 128-lane rows -------------------
    # (metadata-only reshape as long as x is row-major contiguous)
    repacked = False
    if F < _LANE and _LANE % F == 0 and (B * F) % _LANE == 0 and B * F >= _LANE:
        x2 = x.reshape(B * F // _LANE, _LANE)
        w2 = jnp.tile(weight, _LANE // F).reshape(1, _LANE)
        repacked = True
    else:
        # For F >= 128 with F % 128 != 0 the tail vreg uses masked-lane stores.
        # That is negligible; do NOT pad the F axis (it would cost an HBM pass).
        x2 = x
        w2 = weight.reshape(1, F)
    B2, F2 = x2.shape

    # ---- batch tile size -----------------------------------------------------
    # dtype-native sublane multiple: 8 for f32, 16 for bf16, 32 for int8/fp8.
    sub = _SUBLANE * max(1, 4 // x2.dtype.itemsize)
    budget, min_grid = _tile_budget_and_min_grid()

    if block_rows is None:
        row_bytes = max(1, F2 * x2.dtype.itemsize)
        block_rows = max(sub, budget // row_bytes)

    if B2 <= sub:
        tb = B2                      # tiny array: full-dim block is always legal
    else:
        tb = min(int(block_rows), B2)
        tb = max(sub, (tb // sub) * sub)
        # v7x megacore: ensure at least `min_grid` steps so both TCs get work.
        if min_grid > 1 and pl.cdiv(B2, tb) < min_grid and B2 >= min_grid * sub:
            tb = max(sub, ((pl.cdiv(B2, min_grid) + sub - 1) // sub) * sub)

    grid_b = pl.cdiv(B2, tb)
    # No wrapper-side pad/slice: Pallas masks writeback of the ragged tail block.

    out2 = pl.pallas_call(
        _interp_layer_kernel,
        out_shape=jax.ShapeDtypeStruct((B2, F2), out_dtype),
        grid=(grid_b,),
        in_specs=[
            pl.BlockSpec((tb, F2), lambda i: (i, 0)),    # streamed batch tiles
            pl.BlockSpec((1, F2), lambda i: (0, 0)),     # resident weight row
        ],
        out_specs=pl.BlockSpec((tb, F2), lambda i: (i, 0)),
        compiler_params=pltpu.CompilerParams(
            dimension_semantics=("parallel",),           # megacore-shardable
        ),
    )(x2, w2)

    return out2.reshape(B, F) if repacked else out2


if __name__ == "__main__":
    key = jax.random.PRNGKey(0)
    kx, kw = jax.random.split(key)

    # Case 1: module-consistent small shape (batch=8, in_features=32).
    # Exercises the lane-dense repack path: 32 -> 128 lanes.
    B, F = 8, 32
    x = jax.random.normal(kx, (B, F), dtype=jnp.float32)
    weight = jax.random.normal(kw, (F,), dtype=jnp.float32)  # init.normal_(mean=0)

    out = jax.block_until_ready(interpretable_layer(x, weight))
    ref = x * jnp.maximum(weight, 0.0)
    assert out.shape == ref.shape and out.dtype == ref.dtype
    assert jnp.allclose(out, ref, atol=1e-6, rtol=1e-6)

    # Case 2: ragged batch, multi-step pipeline, no wrapper pad/slice:
    # B=200 with tb=64 -> grid=4, tail tile writeback masked by Pallas.
    kx2, kw2 = jax.random.split(jax.random.PRNGKey(1))
    B2, F2 = 200, 384
    x2 = jax.random.normal(kx2, (B2, F2), dtype=jnp.float32)
    w2 = jax.random.normal(kw2, (F2,), dtype=jnp.float32)
    out2 = jax.block_until_ready(interpretable_layer(x2, w2, block_rows=64))
    ref2 = x2 * jnp.maximum(w2, 0.0)
    assert out2.shape == ref2.shape
    assert jnp.allclose(out2, ref2, atol=1e-6, rtol=1e-6)

    # Case 3: bf16 ragged batch — exercises the dtype-native sublane rounding
    # (sub=16) and the masked tail tile for a packed dtype.
    kx3, kw3 = jax.random.split(jax.random.PRNGKey(2))
    B3, F3 = 100, 256
    x3 = jax.random.normal(kx3, (B3, F3), dtype=jnp.bfloat16)
    w3 = jax.random.normal(kw3, (F3,), dtype=jnp.bfloat16)
    out3 = jax.block_until_ready(interpretable_layer(x3, w3, block_rows=32))
    ref3 = x3 * jnp.maximum(w3, jnp.bfloat16(0.0))
    assert out3.shape == ref3.shape and out3.dtype == ref3.dtype
    assert jnp.allclose(out3.astype(jnp.float32), ref3.astype(jnp.float32),
                        atol=1e-2, rtol=1e-2)

    print("KERNEL_OK")
</pallas_src>

<mosaic_0001>
module attributes {stable_mosaic.version = 11 : i64} {
  func.func @_interp_layer_kernel(%arg0: i32, %arg1: memref<2x128xf32, #tpu.memory_space<vmem>>, %arg2: memref<1x128xf32, #tpu.memory_space<vmem>>, %arg3: memref<2x128xf32, #tpu.memory_space<vmem>>) attributes {dimension_semantics = [#tpu.dimension_semantics<parallel>], iteration_bounds = array<i64: 1>, scalar_prefetch = 0 : i64, scratch_operands = 0 : i64, tpu.core_type = #tpu.core_type<tc>, window_params = [{transform_indices = @transform_0, window_bounds = array<i64: 2, 128>}, {pipeline_mode = #tpu.pipeline_mode<synchronous>, transform_indices = @transform_1, window_bounds = array<i64: 1, 128>}, {transform_indices = @transform_2, window_bounds = array<i64: 2, 128>}]} {
    %c0 = arith.constant 0 : index
    %c0_0 = arith.constant 0 : index
    %0 = vector.load %arg2[%c0, %c0_0] : memref<1x128xf32, #tpu.memory_space<vmem>>, vector<1x128xf32>
    %cst = arith.constant 0.000000e+00 : f32
    %1 = vector.broadcast %cst : f32 to vector<1x128xf32>
    %2 = arith.maximumf %0, %1 : vector<1x128xf32>
    %c0_1 = arith.constant 0 : index
    %c0_2 = arith.constant 0 : index
    %3 = vector.load %arg1[%c0_1, %c0_2] : memref<2x128xf32, #tpu.memory_space<vmem>>, vector<2x128xf32>
    %4 = vector.broadcast %2 : vector<1x128xf32> to vector<2x128xf32>
    %5 = arith.mulf %3, %4 : vector<2x128xf32>
    %c0_3 = arith.constant 0 : index
    %c0_4 = arith.constant 0 : index
    %6 = vector.load %arg3[%c0_3, %c0_4] : memref<2x128xf32, #tpu.memory_space<vmem>>, vector<2x128xf32>
    tpu.vector_store %arg3[%c0_3, %c0_4], %5 {strides = array<i32>} : memref<2x128xf32, #tpu.memory_space<vmem>>, vector<2x128xf32>,
    return
  }
  func.func @transform_0(%arg0: i32) -> (i32, i32) {
    %c0_i32 = arith.constant 0 : i32
    %c0_i32_0 = arith.constant 0 : i32
    return %arg0, %c0_i32 : i32, i32
  }
  func.func @transform_1(%arg0: i32) -> (i32, i32) {
    %c0_i32 = arith.constant 0 : i32
    %c0_i32_0 = arith.constant 0 : i32
    %c0_i32_1 = arith.constant 0 : i32
    return %c0_i32, %c0_i32_0 : i32, i32
  }
  func.func @transform_2(%arg0: i32) -> (i32, i32) {
    %c0_i32 = arith.constant 0 : i32
    %c0_i32_0 = arith.constant 0 : i32
    return %arg0, %c0_i32 : i32, i32
  }
}

</mosaic_0001>

<bundles_post_ra>
// kernel: tpu_custom_call.1
= control target key start
LH: loop header
LB: loop body
LE: loop exit
PB: predicated region body
PF: predicated region fallthrough
CT: control target
= control target key end

     0   :  { %7 = vsyncpa [#allocation3], 0  ;;  %s144_s0 = inlined_call_operand.hbm [shape: f32[2,128], index: 0, kind: input, shape index: {}]   ;;  %s145_s1 = inlined_call_operand.vmem [shape: f32[1,128], index: 1, kind: input, shape index: {}]   ;;  %s146_s2 = inlined_call_operand.hbm [shape: f32[2,128], index: 2, kind: output, shape index: {}]  }
   0x1   :  { %8 = vsyncpa [#allocation4], 0  ;;  %s100_s9 = smov [#allocation2]   ;;  %s52_s13 = scalar_lea.hbm %s144_s0, 32 }
   0x2   :  { %s15_s10 = sshll.u32 %s100_s9, 4  ;;  %p53_p0 = scmp.ne.s32.totalorder %s144_s0, %s52_s13  ;;  %s16_s10 = int_to_ptr.vmem [resolvable:$true] %s15_s10 }
   0x3   :  { %p56_p1 = scmp.lt.u32.totalorder %s52_s13, %s144_s0 }
   0x5   :  { %p58_p2 = pnand %p56_p1, %p53_p0 }
   0x7   :  { %61 = shalt.err (!%p58_p2)
}
   0x8   :  { %s62_s18 = scalar_lea.vmem %s16_s10, 32  ;;  %p67_p4 = scmp.lt.s32.totalorder %s16_s10, %s16_s10 }
   0x9   :  { %p63_p3 = scmp.ne.s32.totalorder %s16_s10, %s62_s18  ;;  %p68_p5 = scmp.lt.s32.totalorder %s62_s18, %s62_s18 }
   0xb   :  { %p69_p6 = por %p68_p5, %p67_p4 }
   0xd   :  { %p70_p7 = pnand %p69_p6, %p63_p3 }
   0xf   :  { %73 = shalt.err (!%p70_p7)
}
  0x10   :  { %18 = dma.hbm_to_vmem [thread:$0]  %s144_s0, 32, %s16_s10, [#allocation3]  }
  0x11   :  { %96 = dma.done.wait [#allocation3], 32  }
  0x12   :  { %97 = vsyncadd [#allocation3], 4294967264  ;;  %v28_v0 = vlaneseq  ;;  %v24_v3 = vld [vmem:[%s145_s1] sm:$0x1]  ;;  %s101_s23 = smov [#allocation5]  }
  0x13   :  { %v25_v4 = vmax.f32 %v24_v3, 0.0  ;;  %v26_v5 = vld [vmem:[#allocation2] sm:$0x3]  ;;  %s41_s24 = sshll.u32 %s101_s23, 4  ;;  %s42_s24 = int_to_ptr.vmem [resolvable:$true] %s41_s24 }
  0x14   :  { %v29_v1 = vshrl.u32 %v28_v0, 7  ;;  %s74_s25 = scalar_lea.vmem %s42_s24, 32  ;;  %p79_p9 = scmp.lt.s32.totalorder %s42_s24, %s42_s24 }
  0x15   :  { %p75_p8 = scmp.ne.s32.totalorder %s42_s24, %s74_s25  ;;  %p80_p10 = scmp.lt.s32.totalorder %s74_s25, %s74_s25 }
  0x16   :  { %v30_v2 = vsub.s32 0, %v29_v1 }
  0x17   :  { %p81_p11 = por %p80_p10, %p79_p9 }
  0x18   :  { %v31_v6 = vrot.slane %v25_v4, %v30_v2 }
  0x19   :  { %p82_p12 = pnand %p81_p11, %p75_p8 }
  0x1a   :  { %v33_v7 = vmul.f32 %v31_v6, %v26_v5 }
  0x1c   :  { %34 = vst [vmem:[#allocation5] sm:$0x3] %v33_v7 }
  0x1d   :  { %85 = shalt.err (!%p82_p12)
}
  0x1e   :  { %s86_s27 = scalar_lea.hbm %s146_s2, 32 }
  0x1f   :  { %p87_p13 = scmp.ne.s32.totalorder %s146_s2, %s86_s27  ;;  %p90_p0 = scmp.lt.u32.totalorder %s86_s27, %s146_s2 }
  0x21   :  { %p92_p1 = pnand %p90_p0, %p87_p13 }
  0x23   :  { %95 = shalt.err (!%p92_p1)
}
  0x24   :  { %44 = dma.vmem_to_hbm [thread:$0]  %s42_s24, 32, %s146_s2, [#allocation4]  }
  0x25   :  { %98 = dma.done.wait [#allocation4], 32  }
  0x26   :  { %99 = vsyncadd [#allocation4], 4294967264 }
  0x27   :  { %48 = vsyncpa [#allocation3], 1 }
  0x28   :  { %49 = vsyncpa [#allocation4], 1 }

</bundles_post_ra>
